<compile_context>
chip_gen: v7x
topology: tpu7x:2x2x1
jax: 0.10.0
libtpu: 0.0.40
codegen_flags: <defaults>
</compile_context>

<pallas_src>
import jax
import jax.numpy as jnp
from jax.experimental import pallas as pl
from jax.experimental.pallas import tpu as pltpu


_LANE = 128


def _swish_kernel(beta_ref, x_ref, o_ref):
    # beta: learned scalar parameter held in SMEM as (1, 1) f32.
    beta = beta_ref[0, 0]
    x = x_ref[...]
    # Keep math in f32 for accuracy (mem-bound kernel, compute is free);
    # jax.nn.sigmoid lowers its transcendental onto the EUP slot.
    xf = x.astype(jnp.float32)
    sig = jax.nn.sigmoid(beta * xf)
    o_ref[...] = (xf * sig).astype(o_ref.dtype)


def _chip_tuning():
    """Per-generation (tile_bytes, vmem_limit_bytes | None, num_tensorcores)."""
    kind = ""
    try:
        kind = jax.devices()[0].device_kind.lower()
    except Exception:
        pass
    if "v6" in kind:
        # v6e: 1 TC, 32 MiB scoped-VMEM default -> 4 MiB tiles (4 bufs = 16 MiB).
        return 4 * 1024 * 1024, None, 1
    if "v7" in kind or "7x" in kind:
        # v7x: 2 TCs, ~3.2 TB/s HBM, 64 MiB physical VMEM per TC -> bigger
        # tiles plus an explicit VMEM limit so 4 x 6 MiB clears the 32 MiB
        # scoped default while staying well under the physical capacity.
        return 6 * 1024 * 1024, 48 * 1024 * 1024, 2
    # v5e (16 MiB scoped default) and anything unknown: conservative 2 MiB.
    return 2 * 1024 * 1024, None, 1


def swish(x: jax.Array, beta) -> jax.Array:
    """Swish forward: x * sigmoid(beta * x), elementwise, any shape/dtype."""
    orig_shape = x.shape
    orig_dtype = x.dtype

    flat = x.reshape(-1)
    n = flat.shape[0]
    if n == 0:
        return x

    itemsize = jnp.dtype(orig_dtype).itemsize
    # Sub-32-bit dtypes pack rows along sublanes: 8 (4B), 16 (2B), 32 (1B).
    sub = max(8, 32 // itemsize) if itemsize in (1, 2, 4) else 8
    tile_bytes, vmem_limit, num_tc = _chip_tuning()

    beta_arr = jnp.asarray(beta, dtype=jnp.float32).reshape(1, 1)
    compiler_params = pltpu.CompilerParams(
        dimension_semantics=("parallel",),
        vmem_limit_bytes=vmem_limit,
    )

    # Pick the widest lane width (1024/512/256/128) that divides n exactly so
    # the tensor collapses to a lane-dense 2-D view with zero pad/slice traffic.
    width = None
    for w in (1024, 512, 256, _LANE):
        if n % w == 0:
            width = w
            break

    if width is not None:
        rows = n // width
        x2d = flat.reshape(rows, width)

        # Row-tile sizing: ~tile_bytes per input block, dtype-aware alignment.
        tr_target = max(sub, (tile_bytes // (width * itemsize)) // sub * sub)
        if rows > tr_target:
            tr = tr_target
        elif num_tc >= 2 and rows >= 4 * sub:
            # Mid-sized tensor on a 2-TC chip: >= 4 grid steps (2 per core)
            # keeps megacore sharding AND per-core double buffering.
            tr = pl.cdiv(pl.cdiv(rows, 4), sub) * sub
        else:
            # Single block spanning the whole array (block dims equal to the
            # full array dims are legal even when not sublane-aligned).
            tr = rows
        grid = (pl.cdiv(rows, tr),)

        out = pl.pallas_call(
            _swish_kernel,
            out_shape=jax.ShapeDtypeStruct((rows, width), orig_dtype),
            grid_spec=pltpu.PrefetchScalarGridSpec(
                num_scalar_prefetch=0,
                grid=grid,
                in_specs=[
                    pl.BlockSpec(memory_space=pltpu.SMEM),        # beta scalar
                    pl.BlockSpec((tr, width), lambda i: (i, 0)),  # x tile
                ],
                out_specs=pl.BlockSpec((tr, width), lambda i: (i, 0)),
            ),
            compiler_params=compiler_params,
            input_output_aliases={1: 0},
        )(beta_arr, x2d)
        return out.reshape(orig_shape)

    # Ragged element count (n % 128 != 0): 1-D kernel over the flat tensor.
    # Small tensors use one full-array block (always legal regardless of
    # alignment); large ones use 1024-aligned blocks with a masked final
    # block.  No pad / slice / concat HBM round trips.
    max_block = max(1024, (tile_bytes // itemsize) // 1024 * 1024)
    bn = n if n <= max_block else max_block
    grid = (pl.cdiv(n, bn),)

    out = pl.pallas_call(
        _swish_kernel,
        out_shape=jax.ShapeDtypeStruct((n,), orig_dtype),
        grid_spec=pltpu.PrefetchScalarGridSpec(
            num_scalar_prefetch=0,
            grid=grid,
            in_specs=[
                pl.BlockSpec(memory_space=pltpu.SMEM),   # beta scalar
                pl.BlockSpec((bn,), lambda i: (i,)),     # x chunk
            ],
            out_specs=pl.BlockSpec((bn,), lambda i: (i,)),
        ),
        compiler_params=compiler_params,
        input_output_aliases={1: 0},
    )(beta_arr, flat)
    return out.reshape(orig_shape)


if __name__ == "__main__":
    key = jax.random.PRNGKey(0)
    k0, k1, k2 = jax.random.split(key, 3)

    # Deterministic parameter init, same as nn.Parameter(torch.tensor(1.0)).
    beta = jnp.float32(1.0)

    # Primary check: NCHW input matching a typical PyTorch conv activation.
    x = jax.random.normal(k0, (2, 4, 16, 16), dtype=jnp.float32)
    y_ref = x * jax.nn.sigmoid(beta * x)           # reference computed first
    y = jax.block_until_ready(swish(x, beta))
    assert y.shape == x.shape and y.dtype == x.dtype
    assert jnp.allclose(y, y_ref, atol=1e-6, rtol=1e-6)

    # Ragged element count (exercises the pad-free 1-D path).
    x_odd = jax.random.normal(k1, (3, 5, 7, 11), dtype=jnp.float32)
    y_odd_ref = x_odd * jax.nn.sigmoid(beta * x_odd)
    y_odd = jax.block_until_ready(swish(x_odd, beta))
    assert y_odd.shape == x_odd.shape and y_odd.dtype == x_odd.dtype
    assert jnp.allclose(y_odd, y_odd_ref, atol=1e-6, rtol=1e-6)

    # Mid-sized tensor (single block on 1-TC chips, >=4 steps on v7x).
    x_mid = jax.random.normal(k2, (4, 8, 32, 32), dtype=jnp.float32)
    y_mid_ref = x_mid * jax.nn.sigmoid(beta * x_mid)
    y_mid = jax.block_until_ready(swish(x_mid, beta))
    assert jnp.allclose(y_mid, y_mid_ref, atol=1e-6, rtol=1e-6)

    # bf16 input (exercises the dtype-aware sublane alignment / f32 upcast).
    x_bf16 = jax.random.normal(k0, (2, 4, 16, 16), dtype=jnp.bfloat16)
    xf = x_bf16.astype(jnp.float32)
    y_bf16_ref = (xf * jax.nn.sigmoid(beta * xf)).astype(jnp.bfloat16)
    y_bf16 = jax.block_until_ready(swish(x_bf16, beta))
    assert y_bf16.dtype == jnp.bfloat16
    assert jnp.allclose(y_bf16.astype(jnp.float32),
                        y_bf16_ref.astype(jnp.float32), atol=1e-2, rtol=1e-2)

    print("KERNEL_OK")
</pallas_src>

<mosaic_0001>
module attributes {stable_mosaic.version = 11 : i64} {
  func.func @_swish_kernel(%arg0: i32, %arg1: memref<1x1xf32, #tpu.memory_space<smem>>, %arg2: memref<2x1024xf32, #tpu.memory_space<vmem>>, %arg3: memref<2x1024xf32, #tpu.memory_space<vmem>>) attributes {dimension_semantics = [#tpu.dimension_semantics<parallel>], iteration_bounds = array<i64: 1>, scalar_prefetch = 0 : i64, scratch_operands = 0 : i64, tpu.core_type = #tpu.core_type<tc>, window_params = [{transform_indices = @transform_0, window_bounds = array<i64: 1, 1>}, {transform_indices = @transform_1, window_bounds = array<i64: 2, 1024>}, {transform_indices = @transform_2, window_bounds = array<i64: 2, 1024>}]} {
    %c0 = arith.constant 0 : index
    %c0_0 = arith.constant 0 : index
    %0 = memref.load %arg1[%c0, %c0_0] : memref<1x1xf32, #tpu.memory_space<smem>>
    %c0_1 = arith.constant 0 : index
    %c0_2 = arith.constant 0 : index
    %1 = vector.load %arg2[%c0_1, %c0_2] : memref<2x1024xf32, #tpu.memory_space<vmem>>, vector<2x1024xf32>
    %2 = vector.broadcast %0 : f32 to vector<2x1024xf32>
    %3 = arith.mulf %2, %1 : vector<2x1024xf32>
    %4 = arith.negf %3 : vector<2x1024xf32>
    %5 = math.exp %4 : vector<2x1024xf32>
    %cst = arith.constant 1.000000e+00 : f32
    %6 = vector.broadcast %cst : f32 to vector<2x1024xf32>
    %7 = arith.addf %6, %5 : vector<2x1024xf32>
    %8 = arith.divf %6, %7 : vector<2x1024xf32>
    %9 = arith.mulf %1, %8 : vector<2x1024xf32>
    %c0_3 = arith.constant 0 : index
    %c0_4 = arith.constant 0 : index
    %10 = vector.load %arg3[%c0_3, %c0_4] : memref<2x1024xf32, #tpu.memory_space<vmem>>, vector<2x1024xf32>
    tpu.vector_store %arg3[%c0_3, %c0_4], %9 {strides = array<i32>} : memref<2x1024xf32, #tpu.memory_space<vmem>>, vector<2x1024xf32>,
    return
  }
  func.func @transform_0(%arg0: i32) -> (i32, i32) {
    %c0_i32 = arith.constant 0 : i32
    %c0_i32_0 = arith.constant 0 : i32
    %c0_i32_1 = arith.constant 0 : i32
    return %c0_i32, %c0_i32_0 : i32, i32
  }
  func.func @transform_1(%arg0: i32) -> (i32, i32) {
    %c0_i32 = arith.constant 0 : i32
    %c0_i32_0 = arith.constant 0 : i32
    return %arg0, %c0_i32 : i32, i32
  }
  func.func @transform_2(%arg0: i32) -> (i32, i32) {
    %c0_i32 = arith.constant 0 : i32
    %c0_i32_0 = arith.constant 0 : i32
    return %arg0, %c0_i32 : i32, i32
  }
}

</mosaic_0001>

<bundles_post_ra>
// kernel: tpu_custom_call.1
= control target key start
LH: loop header
LB: loop body
LE: loop exit
PB: predicated region body
PF: predicated region fallthrough
CT: control target
= control target key end

     0   :  { %8 = vsyncpa [#allocation4], 0  ;;  %s166_s0 = inlined_call_operand.<no memory space> [shape: f32[1,1], index: 0, kind: input, shape index: {}]   ;;  %s167_s1 = inlined_call_operand.hbm [shape: f32[2,1024], index: 1, kind: input, shape index: {}, may-alias: {1,2}]   ;;  %s168_s2 = inlined_call_operand.hbm [shape: f32[2,1024], index: 2, kind: output, shape index: {}, may-alias: {1,2}]  }
   0x1   :  { %9 = vsyncpa [#allocation5], 0  ;;  %s122_s9 = smov [#allocation3]   ;;  %s74_s13 = scalar_lea.hbm %s167_s1, 256 }
   0x2   :  { %s18_s10 = sshll.u32 %s122_s9, 4  ;;  %p75_p0 = scmp.ne.s32.totalorder %s167_s1, %s74_s13  ;;  %s19_s10 = int_to_ptr.vmem [resolvable:$true] %s18_s10 }
   0x3   :  { %p78_p1 = scmp.lt.u32.totalorder %s74_s13, %s167_s1 }
   0x5   :  { %p80_p2 = pnand %p78_p1, %p75_p0 }
   0x7   :  { %83 = shalt.err (!%p80_p2)
}
   0x8   :  { %s84_s18 = scalar_lea.vmem %s19_s10, 256  ;;  %p89_p4 = scmp.lt.s32.totalorder %s19_s10, %s19_s10 }
   0x9   :  { %p85_p3 = scmp.ne.s32.totalorder %s19_s10, %s84_s18  ;;  %p90_p5 = scmp.lt.s32.totalorder %s84_s18, %s84_s18 }
   0xb   :  { %p91_p6 = por %p90_p5, %p89_p4 }
   0xd   :  { %p92_p7 = pnand %p91_p6, %p85_p3 }
   0xf   :  { %95 = shalt.err (!%p92_p7)
}
  0x10   :  { %21 = dma.hbm_to_vmem [thread:$0]  %s167_s1, 256, %s19_s10, [#allocation4]  }
  0x11   :  { %118 = dma.done.wait [#allocation4], 256  }
  0x12   :  { %119 = vsyncadd [#allocation4], 4294967040  ;;  %v28_v0 = vstv %s166_s0  ;;  %v26_v1 = vld [vmem:[#allocation3] sm:$0xff]  ;;  %v27_v2 = vld [vmem:[#allocation3 + $0x8] sm:$0xff]  ;;  %s123_s1 = smov [#allocation6]  }
  0x13   :  { %v29_v3 = vmul.f32 %v28_v0, %v26_v1  ;;  %v30_v4 = vmul.f32 %v28_v0, %v27_v2  ;;  %s53_s23 = sshll.u32 %s123_s1, 4  ;;  %s54_s23 = int_to_ptr.vmem [resolvable:$true] %s53_s23 }
  0x14   :  { %s96_s0 = scalar_lea.vmem %s54_s23, 256  ;;  %p101_p9 = scmp.lt.s32.totalorder %s54_s23, %s54_s23 }
  0x15   :  { %v62_v5 = vmul.f32 -1.442695, %v29_v3  ;;  %v63_v6 = vmul.f32 -1.442695, %v30_v4  ;;  %p97_p8 = scmp.ne.s32.totalorder %s54_s23, %s96_s0  ;;  %p102_p10 = scmp.lt.s32.totalorder %s96_s0, %s96_s0 }
  0x17   :  { %66 = vpow2.f32 %v62_v5  ;;  %p103_p11 = por %p102_p10, %p101_p9 }
  0x18   :  { %68 = vpow2.f32 %v63_v6 }
  0x19   :  { %p104_p12 = pnand %p103_p11, %p97_p8 }
  0x21   :  { %v67_v7 = vpop.eup %66 }
  0x22   :  { %v69_v8 = vpop.eup %68  ;;  %v37_v9 = vadd.f32 1.0, %v67_v7 }
  0x23   :  { %v38_v10 = vadd.f32 1.0, %v69_v8 }
  0x24   :  { %70 = vrcp.f32 %v37_v9 }
  0x25   :  { %72 = vrcp.f32 %v38_v10 }
  0x2e   :  { %v71_v11 = vpop.eup %70 }
  0x2f   :  { %v73_v12 = vpop.eup %72  ;;  %v43_v13 = vmul.f32 %v71_v11, %v26_v1 }
  0x30   :  { %v44_v14 = vmul.f32 %v73_v12, %v27_v2 }
  0x31   :  { %45 = vst [vmem:[#allocation6] sm:$0xff] %v43_v13 }
  0x32   :  { %46 = vst [vmem:[#allocation6 + $0x8] sm:$0xff] %v44_v14 }
  0x33   :  { %107 = shalt.err (!%p104_p12)
}
  0x34   :  { %s108_s26 = scalar_lea.hbm %s168_s2, 256 }
  0x35   :  { %p109_p13 = scmp.ne.s32.totalorder %s168_s2, %s108_s26  ;;  %p112_p0 = scmp.lt.u32.totalorder %s108_s26, %s168_s2 }
  0x37   :  { %p114_p1 = pnand %p112_p0, %p109_p13 }
  0x39   :  { %117 = shalt.err (!%p114_p1)
}
  0x3a   :  { %56 = dma.vmem_to_hbm [thread:$0]  %s54_s23, 256, %s168_s2, [#allocation5]  }
  0x3b   :  { %120 = dma.done.wait [#allocation5], 256  }
  0x3c   :  { %121 = vsyncadd [#allocation5], 4294967040 }
  0x3d   :  { %60 = vsyncpa [#allocation4], 1 }
  0x3e   :  { %61 = vsyncpa [#allocation5], 1 }

</bundles_post_ra>
